<compile_context>
chip_gen: v7x
topology: tpu7x:2x2x1
jax: 0.10.0
libtpu: 0.0.40
codegen_flags: <defaults>
</compile_context>

<pallas_src>
import functools
import math

import jax
import jax.numpy as jnp
import numpy as np
from jax.experimental import pallas as pl
from jax.experimental.pallas import tpu as pltpu

_HALF_PI = math.pi / 2.0
_LANES = 128


def _packed_kernel(t_ref, o_ref, *, dim: int, half_dim: int, r: int, scale: float):
    """Lane-dense path: r timesteps packed along the 128-lane axis.

    t_ref: (TB, r) f32   -- r timesteps per packed row
    o_ref: (TB, r*dim) f32 -- one [sin-half | cos-half] segment per timestep
    """
    w = r * dim
    shift = dim.bit_length() - 1                     # dim is a power of two here
    lane = jax.lax.broadcasted_iota(jnp.int32, (r, w), 1)
    row = jax.lax.broadcasted_iota(jnp.int32, (r, w), 0)
    seg = jnp.right_shift(lane, shift)               # which packed timestep owns lane l
    k_in = jnp.bitwise_and(lane, dim - 1)            # lane index within its segment
    is_cos = k_in >= half_dim
    k = jnp.where(is_cos, k_in - half_dim, k_in)
    freq = jnp.exp(k.astype(jnp.float32) * jnp.float32(scale))          # (r, w)
    # Expansion matrix: E[j, l] = freq(l) iff lane l belongs to timestep j.
    e = jnp.where(seg == row, freq, jnp.float32(0.0))                   # (r, w)

    lane_row = jax.lax.broadcasted_iota(jnp.int32, (1, w), 1)
    kin_row = jnp.bitwise_and(lane_row, dim - 1)
    phase = jnp.where(kin_row >= half_dim, jnp.float32(_HALF_PI), jnp.float32(0.0))

    # args[p, l] = t[p, seg(l)] * freq(l): one tiny MXU matmul does the lane
    # expansion and the frequency multiply (no lane rotates / reshapes).
    args = jnp.dot(t_ref[...], e, preferred_element_type=jnp.float32) + phase
    # sin(x + pi/2) == cos(x): single EUP pass, single unmasked full-width store.
    o_ref[...] = jnp.sin(args)


def _rowwise_kernel(t_ref, o_ref, *, dim: int, half_dim: int, scale: float):
    """General fallback: one timestep per output row (any even dim, any batch)."""
    lane = jax.lax.broadcasted_iota(jnp.int32, (1, dim), 1)
    is_cos = lane >= half_dim
    k = jnp.where(is_cos, lane - half_dim, lane)
    freq = jnp.exp(k.astype(jnp.float32) * jnp.float32(scale))
    phase = jnp.where(is_cos, jnp.float32(_HALF_PI), jnp.float32(0.0))
    # Single fused store: no separate sin/cos half stores, no lane rotation.
    o_ref[...] = jnp.sin(t_ref[...] * freq + phase)


def _pick_row_tile(rows: int, out_row_bytes: int, row_tile=None) -> int:
    """Row tile: multiple of 8 sublanes; double-buffered blocks stay well under
    v5e's 16 MiB scoped-VMEM default (and v7x's 32 MiB scoped / 64 MiB physical).
    The time block lane-pads to 128 lanes -> ~512 B per row in VMEM (counted)."""
    if row_tile is not None:
        tb = min(rows, row_tile)
        assert tb == rows or tb % 8 == 0, "row_tile must be a multiple of 8"
        return tb
    if rows <= 8:
        return rows                                   # full-extent block
    bytes_per_row = out_row_bytes + 4 * _LANES        # output row + padded time row
    budget = 2 * 1024 * 1024                          # per-block target
    tb = min(rows, max(8, budget // bytes_per_row))
    return max(8, (tb // 8) * 8)


def sinusoidal_position_embeddings(time: jax.Array, dim: int,
                                   max_period: float = 10000.0, *,
                                   row_tile: int | None = None) -> jax.Array:
    """Pallas equivalent of SinusoidalPositionEmbeddings(dim, max_period)(time)."""
    assert time.ndim == 1, "time must be a 1-D tensor of timesteps"
    assert dim % 2 == 0, "dim must be even (torch.cat of equal sin/cos halves)"
    half_dim = dim // 2
    assert half_dim >= 2, "dim >= 4 required (half_dim - 1 divides)"
    b = time.shape[0]

    scale = -math.log(float(max_period)) / (half_dim - 1)
    t = time.astype(jnp.float32)

    # Lane-dense packing factor: r original rows per 128-lane output row.
    r = _LANES // dim if (dim < _LANES and _LANES % dim == 0) else 1
    packed = (r > 1) and (b % r == 0)

    if packed:
        rows, w = b // r, r * dim                     # w == 128
        t2d = t.reshape(rows, r)                      # free row-major reshape
        kernel = functools.partial(_packed_kernel, dim=dim, half_dim=half_dim,
                                   r=r, scale=scale)
    else:
        rows, w = b, dim
        t2d = t.reshape(rows, 1)
        kernel = functools.partial(_rowwise_kernel, dim=dim, half_dim=half_dim,
                                   scale=scale)

    tb = _pick_row_tile(rows, 4 * w, row_tile)
    grid = (pl.cdiv(rows, tb),)
    t_width = t2d.shape[1]

    out = pl.pallas_call(
        kernel,
        out_shape=jax.ShapeDtypeStruct((rows, w), jnp.float32),
        grid_spec=pltpu.PrefetchScalarGridSpec(
            num_scalar_prefetch=0,
            grid=grid,
            in_specs=[pl.BlockSpec((tb, t_width), lambda i: (i, 0))],   # time rows
            out_specs=pl.BlockSpec((tb, w), lambda i: (i, 0)),
        ),
        # Batch axis is independent; on multi-TC parts the compiler may shard it.
        compiler_params=pltpu.CompilerParams(
            dimension_semantics=("parallel",)),
        cost_estimate=pl.CostEstimate(
            flops=2 * b * dim,                        # freq multiply + phase add
            transcendentals=b * dim,                  # one fused sin per element
            bytes_accessed=4 * (b + b * dim)),        # time in + embeddings out
    )(t2d)

    return out.reshape(b, dim)                        # free row-major unpack


def _reference(time, dim, max_period):
    """Host float64 reference mirroring the PyTorch forward."""
    half = dim // 2
    emb = math.log(max_period) / (half - 1)
    f = np.exp(np.arange(half, dtype=np.float64) * -emb)
    a = np.asarray(time, dtype=np.float64)[:, None] * f[None, :]
    return np.concatenate([np.sin(a), np.cos(a)], axis=-1)


if __name__ == "__main__":
    key = jax.random.PRNGKey(0)
    max_period = 10000.0

    # (batch, dim, row_tile): small deterministic cases covering
    #   - packed lane-dense path, single aligned tile
    #   - packed path with fewer than 8 packed rows (full-extent block)
    #   - row-wise fallback (dim does not divide 128), ragged multi-tile grid
    #   - packed path, multi-tile grid with a ragged last block
    cases = [
        (32, 32, None),
        (8, 32, None),
        (20, 10, 8),
        (40, 64, 8),
    ]

    for idx, (batch, dim, rt) in enumerate(cases):
        k = jax.random.fold_in(key, idx)
        time = jax.random.randint(k, (batch,), 0, 1000).astype(jnp.float32)

        out = jax.block_until_ready(
            sinusoidal_position_embeddings(time, dim, max_period, row_tile=rt))

        assert out.shape == (batch, dim), (out.shape, batch, dim)
        assert out.dtype == jnp.float32

        ref = _reference(time, dim, max_period)
        # f32 phase rounding at args ~1e3 is ~1e-4; the sin(x+pi/2) fusion adds
        # a comparable amount. Values are bounded by 1, so 2e-3 is still tight.
        err = np.max(np.abs(np.asarray(out, dtype=np.float64) - ref))
        assert err < 2e-3, f"case {idx} (b={batch}, dim={dim}): max abs error {err}"

    print("KERNEL_OK")
</pallas_src>

<mosaic_0001>
module attributes {stable_mosaic.version = 11 : i64} {
  func.func @_packed_kernel(%arg0: i32, %arg1: memref<8x4xf32, #tpu.memory_space<vmem>>, %arg2: memref<8x128xf32, #tpu.memory_space<vmem>>) attributes {dimension_semantics = [#tpu.dimension_semantics<parallel>], iteration_bounds = array<i64: 1>, scalar_prefetch = 0 : i64, scratch_operands = 0 : i64, tpu.core_type = #tpu.core_type<tc>, window_params = [{transform_indices = @transform_0, window_bounds = array<i64: 8, 4>}, {transform_indices = @transform_1, window_bounds = array<i64: 8, 128>}]} {
    %0 = tpu.iota {dimensions = array<i32: 1>} : vector<4x128xi32>
    %1 = tpu.iota {dimensions = array<i32: 0>} : vector<4x128xi32>
    %c5_i32 = arith.constant 5 : i32
    %2 = vector.broadcast %c5_i32 : i32 to vector<4x128xi32>
    %3 = arith.shrsi %0, %2 : vector<4x128xi32>
    %c31_i32 = arith.constant 31 : i32
    %4 = vector.broadcast %c31_i32 : i32 to vector<4x128xi32>
    %5 = arith.andi %0, %4 : vector<4x128xi32>
    %c16_i32 = arith.constant 16 : i32
    %6 = vector.broadcast %c16_i32 : i32 to vector<4x128xi32>
    %7 = arith.cmpi sge, %5, %6 : vector<4x128xi32>
    %c16_i32_0 = arith.constant 16 : i32
    %8 = vector.broadcast %c16_i32_0 : i32 to vector<4x128xi32>
    %9 = arith.subi %5, %8 : vector<4x128xi32>
    %10 = arith.select %7, %9, %5 : vector<4x128xi1>, vector<4x128xi32>
    %11 = arith.sitofp %10 : vector<4x128xi32> to vector<4x128xf32>
    %cst = arith.constant -0.614022672 : f32
    %12 = vector.broadcast %cst : f32 to vector<4x128xf32>
    %13 = arith.mulf %11, %12 : vector<4x128xf32>
    %14 = math.exp %13 : vector<4x128xf32>
    %15 = arith.cmpi eq, %3, %1 : vector<4x128xi32>
    %cst_1 = arith.constant 0.000000e+00 : f32
    %16 = vector.broadcast %cst_1 : f32 to vector<4x128xf32>
    %17 = arith.select %15, %14, %16 : vector<4x128xi1>, vector<4x128xf32>
    %18 = tpu.iota {dimensions = array<i32: 1>} : vector<1x128xi32>
    %c31_i32_2 = arith.constant 31 : i32
    %19 = vector.broadcast %c31_i32_2 : i32 to vector<1x128xi32>
    %20 = arith.andi %18, %19 : vector<1x128xi32>
    %c16_i32_3 = arith.constant 16 : i32
    %21 = vector.broadcast %c16_i32_3 : i32 to vector<1x128xi32>
    %22 = arith.cmpi sge, %20, %21 : vector<1x128xi32>
    %cst_4 = arith.constant 1.57079637 : f32
    %cst_5 = arith.constant 0.000000e+00 : f32
    %23 = vector.broadcast %cst_4 : f32 to vector<1x128xf32>
    %24 = vector.broadcast %cst_5 : f32 to vector<1x128xf32>
    %25 = arith.select %22, %23, %24 : vector<1x128xi1>, vector<1x128xf32>
    %c0 = arith.constant 0 : index
    %c0_6 = arith.constant 0 : index
    %26 = vector.load %arg1[%c0, %c0_6] : memref<8x4xf32, #tpu.memory_space<vmem>>, vector<8x4xf32>
    %cst_7 = arith.constant dense<0.000000e+00> : vector<8x128xf32>
    %27 = tpu.matmul %26, %17, %cst_7 {dimension_numbers = #tpu.dot_dimension_numbers<[1], [0], [0], [1], [0, 0, 1, 1], [], []>} : vector<8x4xf32>, vector<4x128xf32>, vector<8x128xf32> -> vector<8x128xf32>
    %28 = vector.broadcast %25 : vector<1x128xf32> to vector<8x128xf32>
    %29 = arith.addf %27, %28 : vector<8x128xf32>
    %30 = math.sin %29 : vector<8x128xf32>
    %c0_8 = arith.constant 0 : index
    %c0_9 = arith.constant 0 : index
    %31 = vector.load %arg2[%c0_8, %c0_9] : memref<8x128xf32, #tpu.memory_space<vmem>>, vector<8x128xf32>
    tpu.vector_store %arg2[%c0_8, %c0_9], %30 {strides = array<i32>} : memref<8x128xf32, #tpu.memory_space<vmem>>, vector<8x128xf32>,
    return
  }
  func.func @transform_0(%arg0: i32) -> (i32, i32) {
    %c0_i32 = arith.constant 0 : i32
    %c0_i32_0 = arith.constant 0 : i32
    return %arg0, %c0_i32 : i32, i32
  }
  func.func @transform_1(%arg0: i32) -> (i32, i32) {
    %c0_i32 = arith.constant 0 : i32
    %c0_i32_0 = arith.constant 0 : i32
    return %arg0, %c0_i32 : i32, i32
  }
}

</mosaic_0001>

<bundles_post_ra>
// kernel: tpu_custom_call.1
= control target key start
LH: loop header
LB: loop body
LE: loop exit
PB: predicated region body
PF: predicated region fallthrough
CT: control target
= control target key end

     0   :  { %v9_v0 = vlaneseq  ;;  %s335_s0 = inlined_call_operand.vmem [shape: f32[8,4], index: 0, kind: input, shape index: {}]   ;;  %s336_s1 = inlined_call_operand.hbm [shape: f32[8,128], index: 1, kind: output, shape index: {}]  }
   0x1   :  { %6 = vsyncpa [#allocation3], 0  ;;  %v280_v1 = vmov 0.0   ;;  %vm281_vm0 = vmmov 0   ;;  %vm30_vm3 = vcmask 1043456   ;;  %v25_v13 = vld [vmem:[%s335_s0] sm:$0xff] }
   0x2   :  { %232 = vmatprep.subr.mxu0 %v280_v1  ;;  %234 = vmatprep.mubr.msk.f32.mxu0 %vm281_vm0, %v280_v1  ;;  %v10_v2 = vand.u32 127, %v9_v0  ;;  %v12_v10 = vshrl.u32 %v9_v0, 7  ;;  %vm26_vm4 = vcmask 31744   ;;  %v282_v28 = vmov 683565275   ;;  %s288_s0 = smov [#allocation2]  }
   0x3   :  { %v283_v30 = vmov 2475754826   ;;  %v284_v33 = vmov 2131351028   ;;  %v285_v36 = vmov 2102212464  }
   0x4   :  { %v14_v3 = vand.u32 31, %v10_v2  ;;  %v13_v11 = vshra.s32 %v10_v2, 5  ;;  %v286_v39 = vmov 920167782   ;;  %v287_v42 = vmov 1326507024  }
   0x5   :  { %s215_s8 = sshll.u32 %s288_s0, 4  ;;  %s216_s8 = int_to_ptr.vmem [resolvable:$true] %s215_s8 }
   0x6   :  { %vm15_vm1 = vcmp.ge.s32.totalorder %v14_v3, 16  ;;  %v223_v4 = vadd.s32 4294967280, %v14_v3  ;;  %vm22_vm2 = vcmp.eq.s32.totalorder %v13_v11, %v12_v10  ;;  %s256_s9 = scalar_lea.vmem %s216_s8, 128  ;;  %p261_p1 = scmp.lt.s32.totalorder %s216_s8, %s216_s8 }
   0x7   :  { %v24_v5 = vsel %vm15_vm1, 1.5707964, %v280_v1  ;;  %p257_p0 = scmp.ne.s32.totalorder %s216_s8, %s256_s9  ;;  %p262_p2 = scmp.lt.s32.totalorder %s256_s9, %s256_s9 }
   0x8   :  { %v17_v6 = vsel %vm15_vm1, %v223_v4, %v14_v3 }
   0x9   :  { %v18_v7 = vcvt.s32.f32 %v17_v6  ;;  %p263_p3 = por %p262_p2, %p261_p1 }
   0xb   :  { %v19_v8 = vmul.f32 -0.6140227, %v18_v7  ;;  %p264_p4 = pnand %p263_p3, %p257_p0 }
   0xd   :  { %v20_v9 = vmul.f32 1.442695, %v19_v8 }
   0xf   :  { %250 = vpow2.f32 %v20_v9 }
  0x19   :  { %v251_v12 = vpop.eup %250 }
  0x1a   :  { %v23_v14 = vsel %vm22_vm2, %v251_v12, 0.0 }
  0x1b   :  { %233 = vmatpush3.msk.msra.mxu0 %vm30_vm3, %v23_v14 }
  0x1c   :  { %235 = vmatmul.mubr.msk.f32.vlgmr.msra.gmra.mrb[0].mxu0 %vm26_vm4, %v25_v13 }
  0xef   :  { %v100_v15 = vpop.f32.mrb[0].mxu0 }
  0xf0   :  { %v302_v16 = vadd.f32 %v100_v15, %v24_v5  ;;  %v236_v17 = vpop.f32.mrb[1].mxu0 }
  0xf2   :  { %v107_v18 = vand.u32 2139095040, %v302_v16  ;;  %v104_v22 = vand.u32 2147483647, %v302_v16  ;;  %vm106_vm12 = vcmp.lt.s32.totalorder %v302_v16, 0  ;;  %vm196_vm1 = vweird.f32 %v302_v16 }
  0xf4   :  { %v108_v19 = vshrl.u32 %v107_v18, 23  ;;  %v111_v25 = vand.u32 8388607, %v104_v22  ;;  %vm105_vm13 = vcmp.le.f32.partialorder %v104_v22, 0.7853982 }
  0xf6   :  { %v226_v20 = vadd.s32 4294967169, %v108_v19  ;;  %v112_v44 = vor.u32 8388608, %v111_v25 }
  0xf8   :  { %v114_v21 = vadd.s32 1, %v226_v20  ;;  %v152_v58 = vshll.u32 %v112_v44, 8 }
  0xfa   :  { %vm115_vm5 = vcmp.gt.s32.totalorder %v114_v21, 0 }
  0xfb   :  { %v116_v23 = vsel %vm115_vm5, %v114_v21, 0 }
  0xfc   :  { %v118_v24 = vand.u32 31, %v116_v23  ;;  %v117_v27 = vshrl.u32 %v116_v23, 5 }
  0xfe   :  { %v119_v26 = vsub.s32 32, %v118_v24  ;;  %v121_v29 = vshll.u32 %v282_v28, %v118_v24  ;;  %v124_v31 = vshll.u32 %v283_v30, %v118_v24  ;;  %v127_v35 = vshll.u32 %v284_v33, %v118_v24 }
  0xff   :  { %v130_v38 = vshll.u32 %v285_v36, %v118_v24  ;;  %v133_v41 = vshll.u32 %v286_v39, %v118_v24  ;;  %vm136_vm6 = vcmp.lt.s32.totalorder %v117_v27, 1  ;;  %vm139_vm7 = vcmp.lt.s32.totalorder %v117_v27, 4 }
 0x100   :  { %v122_v32 = vshrl.u32 %v283_v30, %v119_v26  ;;  %v125_v34 = vshrl.u32 %v284_v33, %v119_v26  ;;  %v128_v37 = vshrl.u32 %v285_v36, %v119_v26  ;;  %v131_v40 = vshrl.u32 %v286_v39, %v119_v26 }
 0x101   :  { %v134_v43 = vshrl.u32 %v287_v42, %v119_v26  ;;  %v120_v53 = vshrl.u32 %v282_v28, %v119_v26  ;;  %vm138_vm8 = vcmp.lt.s32.totalorder %v117_v27, 3  ;;  %vm137_vm9 = vcmp.lt.s32.totalorder %v117_v27, 2 }
 0x102   :  { %v123_v45 = vor.u32 %v122_v32, %v121_v29  ;;  %v126_v46 = vor.u32 %v125_v34, %v124_v31  ;;  %v129_v47 = vor.u32 %v128_v37, %v127_v35  ;;  %v132_v48 = vor.u32 %v131_v40, %v130_v38 }
 0x103   :  { %v135_v49 = vor.u32 %v134_v43, %v133_v41 }
 0x104   :  { %v141_v50 = vsel %vm139_vm7, %v129_v47, 2102212464  ;;  %v144_v51 = vsel %vm136_vm6, %v123_v45, %v126_v46  ;;  %v148_v52 = vsel %vm136_vm6, %v126_v46, %v129_v47  ;;  %v145_v54 = vsel %vm139_vm7, %v132_v48, 920167782 }
 0x105   :  { %v149_v55 = vsel %vm139_vm7, %v135_v49, 1326507024  ;;  %v146_v56 = vsel %vm138_vm8, %v129_v47, %v145_v54  ;;  %v140_v59 = vsel %vm136_vm6, %v120_v53, %v123_v45  ;;  %v142_v60 = vsel %vm138_vm8, %v126_v46, %v141_v50 }
 0x106   :  { %v150_v57 = vsel %vm138_vm8, %v132_v48, %v149_v55  ;;  %v147_v61 = vsel %vm137_vm9, %v144_v51, %v146_v56  ;;  %v143_v3 = vsel %vm137_vm9, %v140_v59, %v142_v60 }
 0x107   :  { %v151_v62 = vsel %vm137_vm9, %v148_v52, %v150_v57  ;;  %v311_v1 = vmul.u32.u64.low %v152_v58, %v147_v61  ;;  %v312_v2 = vmul.u32.u64.high %v152_v58, %v147_v61, %v311_v1  ;;  %v159_v5 = vmul.u32 %v152_v58, %v143_v3 }
 0x108   :  { %v308_v63 = vmul.u32.u64.low %v152_v58, %v151_v62  ;;  %v309_v0 = vmul.u32.u64.high %v152_v58, %v151_v62, %v308_v63 }
 0x109   :  { %v162_v4 = vadd.s32 1, %v312_v2 }
 0x10a   :  { %vm161_vm10 = vc.u32 %v309_v0, %v311_v1  ;;  %v160_v18 = vadd.s32 %v311_v1, %v309_v0 }
 0x10b   :  { %v163_v6 = vsel %vm161_vm10, %v162_v4, %v312_v2 }
 0x10c   :  { %v164_v7 = vadd.s32 %v163_v6, %v159_v5 }
 0x10e   :  { %v165_v8 = vadd.s32 536870912, %v164_v7 }
 0x110   :  { %v166_v9 = vshrl.u32 %v165_v8, 30 }
 0x112   :  { %v167_v10 = vshll.u32 %v166_v9, 30  ;;  %v190_v31 = vsub.s32 4, %v166_v9 }
 0x114   :  { %v168_v11 = vsub.s32 %v164_v7, %v167_v10  ;;  %v191_v34 = vsel %vm106_vm12, %v190_v31, %v166_v9 }
 0x115   :  { %v193_v36 = vsel %vm105_vm13, 0, %v191_v34 }
 0x116   :  { %v170_v12 = vsub.s32 0, %v168_v11  ;;  %v197_v37 = vadd.s32 3, %v193_v36 }
 0x118   :  { %v227_v13 = vmin.u32 %v170_v12, %v168_v11  ;;  %v198_v38 = vand.u32 3, %v197_v37 }
 0x11a   :  { %v172_v14 = vclz %v227_v13  ;;  %vm203_vm14 = vcmp.eq.s32.totalorder %v198_v38, 2  ;;  %vm200_vm15 = vcmp.eq.s32.totalorder %v198_v38, 0  ;;  %vm199_vm0 = vcmp.lt.s32.totalorder %v198_v38, 2 }
 0x11c   :  { %v228_v15 = vadd.s32 4294967294, %v172_v14 }
 0x11e   :  { %vm229_vm11 = vcmp.lt.s32.totalorder %v228_v15, 0 }
 0x11f   :  { %v175_v17 = vsel %vm229_vm11, 0, %v228_v15 }
 0x120   :  { %v176_v19 = vsub.s32 32, %v175_v17  ;;  %v180_v20 = vsub.s32 4294967266, %v175_v17  ;;  %v177_v21 = vshll.u32 %v168_v11, %v175_v17 }
 0x122   :  { %v178_v23 = vshrl.u32 %v160_v18, %v176_v19  ;;  %v181_v24 = vadd.s32 127, %v180_v20 }
 0x124   :  { %v179_v25 = vor.u32 %v178_v23, %v177_v21  ;;  %v182_v26 = vshll.u32 %v181_v24, 23 }
 0x126   :  { %v183_v27 = vor.u32 4788187, %v182_v26  ;;  %v186_v29 = vcvt.s32.f32 %v179_v25 }
 0x128   :  { %v184_v28 = vand.u32 2147483647, %v183_v27 }
 0x12a   :  { %v187_v30 = vmul.f32 %v186_v29, %v184_v28 }
 0x12c   :  { %v188_v32 = vxor.u32 2147483648, %v187_v30 }
 0x12e   :  { %v189_v33 = vsel %vm106_vm12, %v188_v32, %v187_v30 }
 0x12f   :  { %v192_v35 = vsel %vm105_vm13, %v302_v16, %v189_v33 }
 0x130   :  { %252 = vcosq.f32 %v192_v35 }
 0x131   :  { %254 = vsinq.f32 %v192_v35 }
 0x13a   :  { %v253_v39 = vpop.eup %252 }
 0x13b   :  { %v255_v40 = vpop.eup %254  ;;  %v204_v41 = vxor.u32 2147483648, %v253_v39 }
 0x13c   :  { %v201_v42 = vxor.u32 2147483648, %v255_v40 }
 0x13d   :  { %v205_v43 = vsel %vm203_vm14, %v204_v41, %v255_v40 }
 0x13e   :  { %v202_v44 = vsel %vm200_vm15, %v253_v39, %v201_v42 }
 0x13f   :  { %v206_v22 = vsel %vm199_vm0, %v202_v44, %v205_v43 }
 0x140   :  { %v207_v45 = vsel %vm196_vm1, nan, %v206_v22 }
 0x141   :  { %208 = vst [vmem:[#allocation2] sm:$0xff] %v207_v45 }
 0x142   :  { %267 = shalt.err (!%p264_p4)
}
 0x143   :  { %s268_s12 = scalar_lea.hbm %s336_s1, 128 }
 0x144   :  { %p269_p5 = scmp.ne.s32.totalorder %s336_s1, %s268_s12  ;;  %p272_p6 = scmp.lt.u32.totalorder %s268_s12, %s336_s1 }
 0x146   :  { %p274_p7 = pnand %p272_p6, %p269_p5 }
 0x148   :  { %277 = shalt.err (!%p274_p7)
}
 0x149   :  { %218 = dma.vmem_to_hbm [thread:$0]  %s216_s8, 128, %s336_s1, [#allocation3]  }
 0x14a   :  { %278 = dma.done.wait [#allocation3], 128  }
 0x14b   :  { %279 = vsyncadd [#allocation3], 4294967168 }
 0x14c   :  { %222 = vsyncpa [#allocation3], 1 }

</bundles_post_ra>
